<compile_context>
chip_gen: v7x
topology: tpu7x:2x2x1
jax: 0.10.0
libtpu: 0.0.40
codegen_flags: <defaults>
</compile_context>

<pallas_src>
import functools
import math

import jax
import jax.numpy as jnp
from jax import lax
from jax.experimental import pallas as pl
from jax.experimental.pallas import tpu as pltpu


def _double_conv_kernel(x_ref, w1_ref, b1_ref, w2_ref, b2_ref, o_ref,
                        xpad_ref, mid_ref, *, H, W, base):
    """Fused 3x3conv+ReLU -> 3x3conv+ReLU for one batch element.

    Layout: pixels on lanes (flat p = y*W + x), channels on sublanes.

    x_ref   : (1, Cin, H*W)    channels-first flat input block
    w1_ref  : (9, Cout, Cin)   per-tap conv1 weights (compute dtype), tap t = ky*3 + kx
    b1_ref  : (Cout, 1)        conv1 bias (f32)
    w2_ref  : (9, Cout, Cout)  per-tap conv2 weights
    b2_ref  : (Cout, 1)        conv2 bias (f32)
    o_ref   : (1, Cout, H*W)   channels-first flat output block
    xpad_ref: (Cin, P)         conv1 input with zero lane margins, P = 2*base + H*W
    mid_ref : (Cout, P)        conv2 input (= conv1 output) with zero lane margins

    The image interior sits at lane offset `base` (128-aligned, base >= W+1).  Tap
    (ky, kx) then reads the contiguous lane slice starting at base - W - 1 + ky*W + kx;
    vertical (row) padding falls into the zero margins, horizontal (column) padding is
    handled by masking the kx=0 / kx=2 tap groups at x==0 / x==W-1.
    """
    Cin = x_ref.shape[1]
    Cout = o_ref.shape[1]
    HW = H * W
    P = xpad_ref.shape[1]
    cdt = xpad_ref.dtype  # MXU compute dtype (f32 or bf16); accumulation stays f32

    # Column-validity masks, shared by both convs (computed once, kept in vregs).
    col = lax.broadcasted_iota(jnp.int32, (Cout, HW), 1) % W
    not_first_col = col != 0          # kx=0 taps read left padding at x == 0
    not_last_col = col != (W - 1)     # kx=2 taps read right padding at x == W-1

    def conv3x3_relu(src_ref, w_ref, b_ref):
        def tap(ky, kx):
            start = base - W - 1 + ky * W + kx
            return jnp.dot(w_ref[ky * 3 + kx], src_ref[:, start:start + HW],
                           preferred_element_type=jnp.float32)
        left = tap(0, 0) + tap(1, 0) + tap(2, 0)
        centre = tap(0, 1) + tap(1, 1) + tap(2, 1)
        right = tap(0, 2) + tap(1, 2) + tap(2, 2)
        z = (centre + jnp.where(not_first_col, left, 0.0)
                    + jnp.where(not_last_col, right, 0.0))
        return jnp.maximum(z + b_ref[...], 0.0)      # f32 bias + ReLU (VPU)

    # ---- conv1 input staging: zero only the margins + ONE lane-aligned interior copy ----
    xpad_ref[:, 0:base] = jnp.zeros((Cin, base), cdt)
    xpad_ref[:, base + HW:P] = jnp.zeros((Cin, P - base - HW), cdt)
    xpad_ref[:, base:base + HW] = x_ref[0].astype(cdt)

    z1 = conv3x3_relu(xpad_ref, w1_ref, b1_ref)      # (Cout, HW) f32, all positions valid

    # ---- conv1 output -> conv2 padded input, entirely in VMEM ----
    mid_ref[:, 0:base] = jnp.zeros((Cout, base), cdt)
    mid_ref[:, base + HW:P] = jnp.zeros((Cout, P - base - HW), cdt)
    mid_ref[:, base:base + HW] = z1.astype(cdt)

    z2 = conv3x3_relu(mid_ref, w2_ref, b2_ref)
    o_ref[0] = z2.astype(o_ref.dtype)                # single lane-dense output store


def _padded_vmem_bytes(shape, dtype):
    """Rough VMEM footprint of a buffer after (sublane, lane) tile padding."""
    itemsize = jnp.dtype(dtype).itemsize
    shape = tuple(shape)
    if len(shape) < 2:
        shape = (1,) * (2 - len(shape)) + shape
    lead = math.prod(shape[:-2]) if len(shape) > 2 else 1
    sublane_mult = 8 * max(1, 4 // itemsize)     # packed dtypes pack along sublanes
    sub = -(-shape[-2] // sublane_mult) * sublane_mult
    lane = -(-shape[-1] // 128) * 128
    return lead * sub * lane * itemsize


def _double_conv_pallas(x_flat, w1p, b1, w2p, b2, *, H, W):
    """x_flat: (N, Cin, H*W) f32, channels-first flat. Returns (N, Cout, H*W) f32."""
    N, Cin, HW = x_flat.shape
    assert HW == H * W
    assert w1p.shape[0] == 9 and w1p.shape[2] == Cin
    Cout = w1p.shape[1]
    assert w2p.shape == (9, Cout, Cout)

    base = ((W + 1 + 127) // 128) * 128   # lane-aligned placement of the image interior
    P = 2 * base + HW                     # interior + zero margins (>= W+1 each side)

    itemsize = x_flat.dtype.itemsize
    flops = 2 * N * HW * 9 * (Cin * Cout + Cout * Cout)
    bytes_accessed = (x_flat.size * itemsize
                      + w1p.size * w1p.dtype.itemsize + w2p.size * w2p.dtype.itemsize
                      + b1.size * b1.dtype.itemsize + b2.size * b2.dtype.itemsize
                      + N * HW * Cout * itemsize)

    # VMEM budget from the actual buffers: double-buffered pipeline blocks + persistent
    # scratch slabs + headroom for compiler temporaries (re-derive if spatial tiling lands).
    block_bytes = (_padded_vmem_bytes((1, Cin, HW), x_flat.dtype)
                   + _padded_vmem_bytes((1, Cout, HW), x_flat.dtype)
                   + _padded_vmem_bytes(w1p.shape, w1p.dtype)
                   + _padded_vmem_bytes(w2p.shape, w2p.dtype)
                   + _padded_vmem_bytes(b1.shape, b1.dtype)
                   + _padded_vmem_bytes(b2.shape, b2.dtype))
    scratch_bytes = (_padded_vmem_bytes((Cin, P), w1p.dtype)
                     + _padded_vmem_bytes((Cout, P), w1p.dtype))
    vmem_limit = int(min(64 * 1024 * 1024,
                         2 * block_bytes + scratch_bytes + 16 * 1024 * 1024))

    kernel = functools.partial(_double_conv_kernel, H=H, W=W, base=base)
    return pl.pallas_call(
        kernel,
        out_shape=jax.ShapeDtypeStruct((N, Cout, HW), x_flat.dtype),
        grid=(N,),
        in_specs=[
            pl.BlockSpec((1, Cin, HW), lambda n: (n, 0, 0)),
            pl.BlockSpec((9, Cout, Cin), lambda n: (0, 0, 0)),
            pl.BlockSpec((Cout, 1), lambda n: (0, 0)),
            pl.BlockSpec((9, Cout, Cout), lambda n: (0, 0, 0)),
            pl.BlockSpec((Cout, 1), lambda n: (0, 0)),
        ],
        out_specs=pl.BlockSpec((1, Cout, HW), lambda n: (n, 0, 0)),
        scratch_shapes=[
            pltpu.VMEM((Cin, P), w1p.dtype),    # conv1 padded input slab
            pltpu.VMEM((Cout, P), w1p.dtype),   # conv2 padded input slab (VMEM-resident)
        ],
        compiler_params=pltpu.CompilerParams(
            dimension_semantics=("parallel",),
            vmem_limit_bytes=vmem_limit),
        cost_estimate=pl.CostEstimate(flops=flops, transcendentals=0,
                                      bytes_accessed=bytes_accessed),
    )(x_flat, w1p, b1, w2p, b2)


def init_double_conv_params(key, in_c, out_c):
    """Deterministic init matching PyTorch Conv2d default shapes (OIHW + bias)."""
    k1, k2, k3, k4 = jax.random.split(key, 4)

    def conv_init(kw, kb, cin, cout):
        fan_in = cin * 3 * 3
        bound = 1.0 / jnp.sqrt(fan_in)
        w = jax.random.uniform(kw, (cout, cin, 3, 3), jnp.float32, -bound, bound)
        b = jax.random.uniform(kb, (cout,), jnp.float32, -bound, bound)
        return w, b

    w1, b1 = conv_init(k1, k2, in_c, out_c)
    w2, b2 = conv_init(k3, k4, out_c, out_c)
    return {"w1": w1, "b1": b1, "w2": w2, "b2": b2}


def pack_double_conv_params(params, compute_dtype=jnp.float32):
    """One-time weight repack (hoisted out of the jitted forward): OIHW -> (9, Cout, Cin).

    compute_dtype=bf16 feeds the MXU in its native dtype (and uses bf16 activation
    scratch); accumulation and the bias/ReLU epilogue stay f32 inside the kernel.
    """
    def pack(w_oihw):
        co, ci = w_oihw.shape[0], w_oihw.shape[1]
        return (jnp.transpose(w_oihw, (2, 3, 0, 1))      # (3,3,Cout,Cin)
                .reshape(9, co, ci).astype(compute_dtype))

    return {
        "w1p": pack(params["w1"]),
        "b1": params["b1"].reshape(-1, 1).astype(jnp.float32),
        "w2p": pack(params["w2"]),
        "b2": params["b2"].reshape(-1, 1).astype(jnp.float32),
    }


@functools.partial(jax.jit, static_argnames=("drop_proba",))
def double_conv_forward(x_nchw, packed, drop_proba=0.0):
    """Double_Conv.forward: conv3x3 -> ReLU -> conv3x3 -> ReLU (batch_norm=False)."""
    if drop_proba != 0.0:
        # TODO(synk): stochastic Dropout2d (random channel masking) not implemented.
        raise NotImplementedError("training-mode Dropout2d not implemented")
    N, Cin, H, W = x_nchw.shape
    Cout = packed["w1p"].shape[1]
    # NCHW -> (N, C, H*W) is a PURE reshape (no transpose) in the channels-first layout.
    x = x_nchw.reshape(N, Cin, H * W)
    y = _double_conv_pallas(x, packed["w1p"], packed["b1"],
                            packed["w2p"], packed["b2"], H=H, W=W)
    return y.reshape(N, Cout, H, W)


def _reference_double_conv(x_nchw, params):
    """Pure-JAX reference (lax conv) for correctness checking."""
    def conv(x, w, b):
        y = lax.conv_general_dilated(
            x, w, window_strides=(1, 1), padding=((1, 1), (1, 1)),
            dimension_numbers=("NCHW", "OIHW", "NCHW"))
        return jnp.maximum(y + b[None, :, None, None], 0.0)

    y = conv(x_nchw, params["w1"], params["b1"])
    y = conv(y, params["w2"], params["b2"])
    return y


if __name__ == "__main__":
    batch, in_c, out_c, spatial = 2, 4, 8, 16

    key = jax.random.PRNGKey(0)
    k_x, k_p = jax.random.split(key)
    x = jax.random.normal(k_x, (batch, in_c, spatial, spatial), jnp.float32)
    params = init_double_conv_params(k_p, in_c, out_c)

    ref = _reference_double_conv(x, params)

    # f32 path: matches the PyTorch module's numerics.
    packed_f32 = pack_double_conv_params(params, jnp.float32)
    out = jax.block_until_ready(double_conv_forward(x, packed_f32, drop_proba=0.0))
    assert out.shape == (batch, out_c, spatial, spatial)
    assert jnp.allclose(out, ref, rtol=1e-4, atol=1e-5), "f32 kernel mismatch vs reference"

    # bf16-MXU path (bf16 weights + bf16 activation scratch; f32 accumulate + epilogue).
    packed_bf16 = pack_double_conv_params(params, jnp.bfloat16)
    out_bf16 = jax.block_until_ready(double_conv_forward(x, packed_bf16, drop_proba=0.0))
    assert jnp.allclose(out_bf16, ref, rtol=5e-2, atol=5e-2), "bf16 kernel mismatch vs reference"

    print("KERNEL_OK")
</pallas_src>

<mosaic_0001>
module attributes {stable_mosaic.version = 11 : i64} {
  func.func @_double_conv_kernel(%arg0: i32, %arg1: memref<1x4x256xf32, #tpu.memory_space<vmem>>, %arg2: memref<9x8x4xf32, #tpu.memory_space<vmem>>, %arg3: memref<8x1xf32, #tpu.memory_space<vmem>>, %arg4: memref<9x8x8xf32, #tpu.memory_space<vmem>>, %arg5: memref<8x1xf32, #tpu.memory_space<vmem>>, %arg6: memref<1x8x256xf32, #tpu.memory_space<vmem>>, %arg7: memref<4x512xf32, #tpu.memory_space<vmem>>, %arg8: memref<8x512xf32, #tpu.memory_space<vmem>>) attributes {dimension_semantics = [#tpu.dimension_semantics<parallel>], iteration_bounds = array<i64: 2>, scalar_prefetch = 0 : i64, scratch_operands = 2 : i64, tpu.core_type = #tpu.core_type<tc>, window_params = [{transform_indices = @transform_0, window_bounds = array<i64: 1, 4, 256>}, {pipeline_mode = #tpu.pipeline_mode<synchronous>, transform_indices = @transform_1, window_bounds = array<i64: 9, 8, 4>}, {pipeline_mode = #tpu.pipeline_mode<synchronous>, transform_indices = @transform_2, window_bounds = array<i64: 8, 1>}, {pipeline_mode = #tpu.pipeline_mode<synchronous>, transform_indices = @transform_3, window_bounds = array<i64: 9, 8, 8>}, {pipeline_mode = #tpu.pipeline_mode<synchronous>, transform_indices = @transform_4, window_bounds = array<i64: 8, 1>}, {transform_indices = @transform_5, window_bounds = array<i64: 1, 8, 256>}]} {
    %0 = tpu.iota {dimensions = array<i32: 1>} : vector<8x256xi32>
    %c16_i32 = arith.constant 16 : i32
    %c0_i32 = arith.constant 0 : i32
    %1 = arith.cmpi eq, %c16_i32, %c0_i32 : i32
    %c1_i32 = arith.constant 1 : i32
    %2 = arith.select %1, %c1_i32, %c16_i32 : i32
    %3 = vector.broadcast %2 : i32 to vector<8x256xi32>
    %4 = arith.remsi %0, %3 : vector<8x256xi32>
    %c0_i32_0 = arith.constant 0 : i32
    %5 = vector.broadcast %c0_i32_0 : i32 to vector<8x256xi32>
    %6 = arith.cmpi ne, %4, %5 : vector<8x256xi32>
    %c0_i32_1 = arith.constant 0 : i32
    %7 = vector.broadcast %c0_i32_1 : i32 to vector<8x256xi32>
    %8 = arith.cmpi slt, %4, %7 : vector<8x256xi32>
    %c0_i32_2 = arith.constant 0 : i32
    %9 = arith.cmpi slt, %2, %c0_i32_2 : i32
    %10 = vector.broadcast %9 : i1 to vector<8x256xi1>
    %11 = vector.broadcast %10 : vector<8x256xi1> to vector<8x256xi1>
    %12 = arith.xori %8, %11 : vector<8x256xi1>
    %13 = arith.andi %12, %6 : vector<8x256xi1>
    %14 = vector.broadcast %2 : i32 to vector<8x256xi32>
    %15 = arith.addi %4, %14 : vector<8x256xi32>
    %16 = arith.select %13, %15, %4 : vector<8x256xi1>, vector<8x256xi32>
    %c0_i32_3 = arith.constant 0 : i32
    %17 = vector.broadcast %c0_i32_3 : i32 to vector<8x256xi32>
    %18 = arith.cmpi ne, %16, %17 : vector<8x256xi32>
    %c15_i32 = arith.constant 15 : i32
    %19 = vector.broadcast %c15_i32 : i32 to vector<8x256xi32>
    %20 = arith.cmpi ne, %16, %19 : vector<8x256xi32>
    %cst = arith.constant 0.000000e+00 : f32
    %21 = vector.broadcast %cst : f32 to vector<4x128xf32>
    %c0 = arith.constant 0 : index
    %c0_4 = arith.constant 0 : index
    %22 = vector.load %arg7[%c0, %c0_4] : memref<4x512xf32, #tpu.memory_space<vmem>>, vector<4x128xf32>
    tpu.vector_store %arg7[%c0, %c0_4], %21 {strides = array<i32>} : memref<4x512xf32, #tpu.memory_space<vmem>>, vector<4x128xf32>,
    %cst_5 = arith.constant 0.000000e+00 : f32
    %23 = vector.broadcast %cst_5 : f32 to vector<4x128xf32>
    %c0_6 = arith.constant 0 : index
    %c384 = arith.constant 384 : index
    %24 = vector.load %arg7[%c0_6, %c384] : memref<4x512xf32, #tpu.memory_space<vmem>>, vector<4x128xf32>
    tpu.vector_store %arg7[%c0_6, %c384], %23 {strides = array<i32>} : memref<4x512xf32, #tpu.memory_space<vmem>>, vector<4x128xf32>,
    %c0_7 = arith.constant 0 : index
    %c0_8 = arith.constant 0 : index
    %c0_9 = arith.constant 0 : index
    %25 = vector.load %arg1[%c0_7, %c0_8, %c0_9] : memref<1x4x256xf32, #tpu.memory_space<vmem>>, vector<1x4x256xf32>
    %26 = vector.shape_cast %25 : vector<1x4x256xf32> to vector<4x256xf32>
    %c0_10 = arith.constant 0 : index
    %c128 = arith.constant 128 : index
    %27 = vector.load %arg7[%c0_10, %c128] : memref<4x512xf32, #tpu.memory_space<vmem>>, vector<4x256xf32>
    tpu.vector_store %arg7[%c0_10, %c128], %26 {strides = array<i32>} : memref<4x512xf32, #tpu.memory_space<vmem>>, vector<4x256xf32>,
    %c0_11 = arith.constant 0 : index
    %c0_12 = arith.constant 0 : index
    %c0_13 = arith.constant 0 : index
    %28 = vector.load %arg2[%c0_11, %c0_12, %c0_13] : memref<9x8x4xf32, #tpu.memory_space<vmem>>, vector<1x8x4xf32>
    %29 = vector.shape_cast %28 : vector<1x8x4xf32> to vector<8x4xf32>
    %c0_14 = arith.constant 0 : index
    %c111 = arith.constant 111 : index
    %30 = vector.load %arg7[%c0_14, %c111] : memref<4x512xf32, #tpu.memory_space<vmem>>, vector<4x256xf32>
    %cst_15 = arith.constant dense<0.000000e+00> : vector<8x256xf32>
    %31 = tpu.matmul %29, %30, %cst_15 {dimension_numbers = #tpu.dot_dimension_numbers<[1], [0], [0], [1], [0, 0, 1, 1], [], []>} : vector<8x4xf32>, vector<4x256xf32>, vector<8x256xf32> -> vector<8x256xf32>
    %c3 = arith.constant 3 : index
    %c0_16 = arith.constant 0 : index
    %c0_17 = arith.constant 0 : index
    %32 = vector.load %arg2[%c3, %c0_16, %c0_17] : memref<9x8x4xf32, #tpu.memory_space<vmem>>, vector<1x8x4xf32>
    %33 = vector.shape_cast %32 : vector<1x8x4xf32> to vector<8x4xf32>
    %c0_18 = arith.constant 0 : index
    %c127 = arith.constant 127 : index
    %34 = vector.load %arg7[%c0_18, %c127] : memref<4x512xf32, #tpu.memory_space<vmem>>, vector<4x256xf32>
    %cst_19 = arith.constant dense<0.000000e+00> : vector<8x256xf32>
    %35 = tpu.matmul %33, %34, %cst_19 {dimension_numbers = #tpu.dot_dimension_numbers<[1], [0], [0], [1], [0, 0, 1, 1], [], []>} : vector<8x4xf32>, vector<4x256xf32>, vector<8x256xf32> -> vector<8x256xf32>
    %36 = arith.addf %31, %35 : vector<8x256xf32>
    %c6 = arith.constant 6 : index
    %c0_20 = arith.constant 0 : index
    %c0_21 = arith.constant 0 : index
    %37 = vector.load %arg2[%c6, %c0_20, %c0_21] : memref<9x8x4xf32, #tpu.memory_space<vmem>>, vector<1x8x4xf32>
    %38 = vector.shape_cast %37 : vector<1x8x4xf32> to vector<8x4xf32>
    %c0_22 = arith.constant 0 : index
    %c143 = arith.constant 143 : index
    %39 = vector.load %arg7[%c0_22, %c143] : memref<4x512xf32, #tpu.memory_space<vmem>>, vector<4x256xf32>
    %cst_23 = arith.constant dense<0.000000e+00> : vector<8x256xf32>
    %40 = tpu.matmul %38, %39, %cst_23 {dimension_numbers = #tpu.dot_dimension_numbers<[1], [0], [0], [1], [0, 0, 1, 1], [], []>} : vector<8x4xf32>, vector<4x256xf32>, vector<8x256xf32> -> vector<8x256xf32>
    %41 = arith.addf %36, %40 : vector<8x256xf32>
    %c1 = arith.constant 1 : index
    %c0_24 = arith.constant 0 : index
    %c0_25 = arith.constant 0 : index
    %42 = vector.load %arg2[%c1, %c0_24, %c0_25] : memref<9x8x4xf32, #tpu.memory_space<vmem>>, vector<1x8x4xf32>
    %43 = vector.shape_cast %42 : vector<1x8x4xf32> to vector<8x4xf32>
    %c0_26 = arith.constant 0 : index
    %c112 = arith.constant 112 : index
    %44 = vector.load %arg7[%c0_26, %c112] : memref<4x512xf32, #tpu.memory_space<vmem>>, vector<4x256xf32>
    %cst_27 = arith.constant dense<0.000000e+00> : vector<8x256xf32>
    %45 = tpu.matmul %43, %44, %cst_27 {dimension_numbers = #tpu.dot_dimension_numbers<[1], [0], [0], [1], [0, 0, 1, 1], [], []>} : vector<8x4xf32>, vector<4x256xf32>, vector<8x256xf32> -> vector<8x256xf32>
    %c4 = arith.constant 4 : index
    %c0_28 = arith.constant 0 : index
    %c0_29 = arith.constant 0 : index
    %46 = vector.load %arg2[%c4, %c0_28, %c0_29] : memref<9x8x4xf32, #tpu.memory_space<vmem>>, vector<1x8x4xf32>
    %47 = vector.shape_cast %46 : vector<1x8x4xf32> to vector<8x4xf32>
    %c0_30 = arith.constant 0 : index
    %c128_31 = arith.constant 128 : index
    %48 = vector.load %arg7[%c0_30, %c128_31] : memref<4x512xf32, #tpu.memory_space<vmem>>, vector<4x256xf32>
    %cst_32 = arith.constant dense<0.000000e+00> : vector<8x256xf32>
    %49 = tpu.matmul %47, %48, %cst_32 {dimension_numbers = #tpu.dot_dimension_numbers<[1], [0], [0], [1], [0, 0, 1, 1], [], []>} : vector<8x4xf32>, vector<4x256xf32>, vector<8x256xf32> -> vector<8x256xf32>
    %50 = arith.addf %45, %49 : vector<8x256xf32>
    %c7 = arith.constant 7 : index
    %c0_33 = arith.constant 0 : index
    %c0_34 = arith.constant 0 : index
    %51 = vector.load %arg2[%c7, %c0_33, %c0_34] : memref<9x8x4xf32, #tpu.memory_space<vmem>>, vector<1x8x4xf32>
    %52 = vector.shape_cast %51 : vector<1x8x4xf32> to vector<8x4xf32>
    %c0_35 = arith.constant 0 : index
    %c144 = arith.constant 144 : index
    %53 = vector.load %arg7[%c0_35, %c144] : memref<4x512xf32, #tpu.memory_space<vmem>>, vector<4x256xf32>
    %cst_36 = arith.constant dense<0.000000e+00> : vector<8x256xf32>
    %54 = tpu.matmul %52, %53, %cst_36 {dimension_numbers = #tpu.dot_dimension_numbers<[1], [0], [0], [1], [0, 0, 1, 1], [], []>} : vector<8x4xf32>, vector<4x256xf32>, vector<8x256xf32> -> vector<8x256xf32>
    %55 = arith.addf %50, %54 : vector<8x256xf32>
    %c2 = arith.constant 2 : index
    %c0_37 = arith.constant 0 : index
    %c0_38 = arith.constant 0 : index
    %56 = vector.load %arg2[%c2, %c0_37, %c0_38] : memref<9x8x4xf32, #tpu.memory_space<vmem>>, vector<1x8x4xf32>
    %57 = vector.shape_cast %56 : vector<1x8x4xf32> to vector<8x4xf32>
    %c0_39 = arith.constant 0 : index
    %c113 = arith.constant 113 : index
    %58 = vector.load %arg7[%c0_39, %c113] : memref<4x512xf32, #tpu.memory_space<vmem>>, vector<4x256xf32>
    %cst_40 = arith.constant dense<0.000000e+00> : vector<8x256xf32>
    %59 = tpu.matmul %57, %58, %cst_40 {dimension_numbers = #tpu.dot_dimension_numbers<[1], [0], [0], [1], [0, 0, 1, 1], [], []>} : vector<8x4xf32>, vector<4x256xf32>, vector<8x256xf32> -> vector<8x256xf32>
    %c5 = arith.constant 5 : index
    %c0_41 = arith.constant 0 : index
    %c0_42 = arith.constant 0 : index
    %60 = vector.load %arg2[%c5, %c0_41, %c0_42] : memref<9x8x4xf32, #tpu.memory_space<vmem>>, vector<1x8x4xf32>
    %61 = vector.shape_cast %60 : vector<1x8x4xf32> to vector<8x4xf32>
    %c0_43 = arith.constant 0 : index
    %c129 = arith.constant 129 : index
    %62 = vector.load %arg7[%c0_43, %c129] : memref<4x512xf32, #tpu.memory_space<vmem>>, vector<4x256xf32>
    %cst_44 = arith.constant dense<0.000000e+00> : vector<8x256xf32>
    %63 = tpu.matmul %61, %62, %cst_44 {dimension_numbers = #tpu.dot_dimension_numbers<[1], [0], [0], [1], [0, 0, 1, 1], [], []>} : vector<8x4xf32>, vector<4x256xf32>, vector<8x256xf32> -> vector<8x256xf32>
    %64 = arith.addf %59, %63 : vector<8x256xf32>
    %c8 = arith.constant 8 : index
    %c0_45 = arith.constant 0 : index
    %c0_46 = arith.constant 0 : index
    %65 = vector.load %arg2[%c8, %c0_45, %c0_46] : memref<9x8x4xf32, #tpu.memory_space<vmem>>, vector<1x8x4xf32>
    %66 = vector.shape_cast %65 : vector<1x8x4xf32> to vector<8x4xf32>
    %c0_47 = arith.constant 0 : index
    %c145 = arith.constant 145 : index
    %67 = vector.load %arg7[%c0_47, %c145] : memref<4x512xf32, #tpu.memory_space<vmem>>, vector<4x256xf32>
    %cst_48 = arith.constant dense<0.000000e+00> : vector<8x256xf32>
    %68 = tpu.matmul %66, %67, %cst_48 {dimension_numbers = #tpu.dot_dimension_numbers<[1], [0], [0], [1], [0, 0, 1, 1], [], []>} : vector<8x4xf32>, vector<4x256xf32>, vector<8x256xf32> -> vector<8x256xf32>
    %69 = arith.addf %64, %68 : vector<8x256xf32>
    %cst_49 = arith.constant 0.000000e+00 : f32
    %70 = vector.broadcast %cst_49 : f32 to vector<8x256xf32>
    %71 = arith.select %18, %41, %70 : vector<8x256xi1>, vector<8x256xf32>
    %72 = arith.addf %55, %71 : vector<8x256xf32>
    %cst_50 = arith.constant 0.000000e+00 : f32
    %73 = vector.broadcast %cst_50 : f32 to vector<8x256xf32>
    %74 = arith.select %20, %69, %73 : vector<8x256xi1>, vector<8x256xf32>
    %75 = arith.addf %72, %74 : vector<8x256xf32>
    %c0_51 = arith.constant 0 : index
    %c0_52 = arith.constant 0 : index
    %76 = vector.load %arg3[%c0_51, %c0_52] : memref<8x1xf32, #tpu.memory_space<vmem>>, vector<8x1xf32>
    %77 = vector.broadcast %76 : vector<8x1xf32> to vector<8x256xf32>
    %78 = arith.addf %75, %77 : vector<8x256xf32>
    %cst_53 = arith.constant 0.000000e+00 : f32
    %79 = vector.broadcast %cst_53 : f32 to vector<8x256xf32>
    %80 = arith.maximumf %78, %79 : vector<8x256xf32>
    %cst_54 = arith.constant 0.000000e+00 : f32
    %81 = vector.broadcast %cst_54 : f32 to vector<8x128xf32>
    %c0_55 = arith.constant 0 : index
    %c0_56 = arith.constant 0 : index
    %82 = vector.load %arg8[%c0_55, %c0_56] : memref<8x512xf32, #tpu.memory_space<vmem>>, vector<8x128xf32>
    tpu.vector_store %arg8[%c0_55, %c0_56], %81 {strides = array<i32>} : memref<8x512xf32, #tpu.memory_space<vmem>>, vector<8x128xf32>,
    %cst_57 = arith.constant 0.000000e+00 : f32
    %83 = vector.broadcast %cst_57 : f32 to vector<8x128xf32>
    %c0_58 = arith.constant 0 : index
    %c384_59 = arith.constant 384 : index
    %84 = vector.load %arg8[%c0_58, %c384_59] : memref<8x512xf32, #tpu.memory_space<vmem>>, vector<8x128xf32>
    tpu.vector_store %arg8[%c0_58, %c384_59], %83 {strides = array<i32>} : memref<8x512xf32, #tpu.memory_space<vmem>>, vector<8x128xf32>,
    %c0_60 = arith.constant 0 : index
    %c128_61 = arith.constant 128 : index
    %85 = vector.load %arg8[%c0_60, %c128_61] : memref<8x512xf32, #tpu.memory_space<vmem>>, vector<8x256xf32>
    tpu.vector_store %arg8[%c0_60, %c128_61], %80 {strides = array<i32>} : memref<8x512xf32, #tpu.memory_space<vmem>>, vector<8x256xf32>,
    %c0_62 = arith.constant 0 : index
    %c0_63 = arith.constant 0 : index
    %c0_64 = arith.constant 0 : index
    %86 = vector.load %arg4[%c0_62, %c0_63, %c0_64] : memref<9x8x8xf32, #tpu.memory_space<vmem>>, vector<1x8x8xf32>
    %87 = vector.shape_cast %86 : vector<1x8x8xf32> to vector<8x8xf32>
    %c0_65 = arith.constant 0 : index
    %c111_66 = arith.constant 111 : index
    %88 = vector.load %arg8[%c0_65, %c111_66] : memref<8x512xf32, #tpu.memory_space<vmem>>, vector<8x256xf32>
    %cst_67 = arith.constant dense<0.000000e+00> : vector<8x256xf32>
    %89 = tpu.matmul %87, %88, %cst_67 {dimension_numbers = #tpu.dot_dimension_numbers<[1], [0], [0], [1], [0, 0, 1, 1], [], []>} : vector<8x8xf32>, vector<8x256xf32>, vector<8x256xf32> -> vector<8x256xf32>
    %c3_68 = arith.constant 3 : index
    %c0_69 = arith.constant 0 : index
    %c0_70 = arith.constant 0 : index
    %90 = vector.load %arg4[%c3_68, %c0_69, %c0_70] : memref<9x8x8xf32, #tpu.memory_space<vmem>>, vector<1x8x8xf32>
    %91 = vector.shape_cast %90 : vector<1x8x8xf32> to vector<8x8xf32>
    %c0_71 = arith.constant 0 : index
    %c127_72 = arith.constant 127 : index
    %92 = vector.load %arg8[%c0_71, %c127_72] : memref<8x512xf32, #tpu.memory_space<vmem>>, vector<8x256xf32>
    %cst_73 = arith.constant dense<0.000000e+00> : vector<8x256xf32>
    %93 = tpu.matmul %91, %92, %cst_73 {dimension_numbers = #tpu.dot_dimension_numbers<[1], [0], [0], [1], [0, 0, 1, 1], [], []>} : vector<8x8xf32>, vector<8x256xf32>, vector<8x256xf32> -> vector<8x256xf32>
    %94 = arith.addf %89, %93 : vector<8x256xf32>
    %c6_74 = arith.constant 6 : index
    %c0_75 = arith.constant 0 : index
    %c0_76 = arith.constant 0 : index
    %95 = vector.load %arg4[%c6_74, %c0_75, %c0_76] : memref<9x8x8xf32, #tpu.memory_space<vmem>>, vector<1x8x8xf32>
    %96 = vector.shape_cast %95 : vector<1x8x8xf32> to vector<8x8xf32>
    %c0_77 = arith.constant 0 : index
    %c143_78 = arith.constant 143 : index
    %97 = vector.load %arg8[%c0_77, %c143_78] : memref<8x512xf32, #tpu.memory_space<vmem>>, vector<8x256xf32>
    %cst_79 = arith.constant dense<0.000000e+00> : vector<8x256xf32>
    %98 = tpu.matmul %96, %97, %cst_79 {dimension_numbers = #tpu.dot_dimension_numbers<[1], [0], [0], [1], [0, 0, 1, 1], [], []>} : vector<8x8xf32>, vector<8x256xf32>, vector<8x256xf32> -> vector<8x256xf32>
    %99 = arith.addf %94, %98 : vector<8x256xf32>
    %c1_80 = arith.constant 1 : index
    %c0_81 = arith.constant 0 : index
    %c0_82 = arith.constant 0 : index
    %100 = vector.load %arg4[%c1_80, %c0_81, %c0_82] : memref<9x8x8xf32, #tpu.memory_space<vmem>>, vector<1x8x8xf32>
    %101 = vector.shape_cast %100 : vector<1x8x8xf32> to vector<8x8xf32>
    %c0_83 = arith.constant 0 : index
    %c112_84 = arith.constant 112 : index
    %102 = vector.load %arg8[%c0_83, %c112_84] : memref<8x512xf32, #tpu.memory_space<vmem>>, vector<8x256xf32>
    %cst_85 = arith.constant dense<0.000000e+00> : vector<8x256xf32>
    %103 = tpu.matmul %101, %102, %cst_85 {dimension_numbers = #tpu.dot_dimension_numbers<[1], [0], [0], [1], [0, 0, 1, 1], [], []>} : vector<8x8xf32>, vector<8x256xf32>, vector<8x256xf32> -> vector<8x256xf32>
    %c4_86 = arith.constant 4 : index
    %c0_87 = arith.constant 0 : index
    %c0_88 = arith.constant 0 : index
    %104 = vector.load %arg4[%c4_86, %c0_87, %c0_88] : memref<9x8x8xf32, #tpu.memory_space<vmem>>, vector<1x8x8xf32>
    %105 = vector.shape_cast %104 : vector<1x8x8xf32> to vector<8x8xf32>
    %c0_89 = arith.constant 0 : index
    %c128_90 = arith.constant 128 : index
    %106 = vector.load %arg8[%c0_89, %c128_90] : memref<8x512xf32, #tpu.memory_space<vmem>>, vector<8x256xf32>
    %cst_91 = arith.constant dense<0.000000e+00> : vector<8x256xf32>
    %107 = tpu.matmul %105, %106, %cst_91 {dimension_numbers = #tpu.dot_dimension_numbers<[1], [0], [0], [1], [0, 0, 1, 1], [], []>} : vector<8x8xf32>, vector<8x256xf32>, vector<8x256xf32> -> vector<8x256xf32>
    %108 = arith.addf %103, %107 : vector<8x256xf32>
    %c7_92 = arith.constant 7 : index
    %c0_93 = arith.constant 0 : index
    %c0_94 = arith.constant 0 : index
    %109 = vector.load %arg4[%c7_92, %c0_93, %c0_94] : memref<9x8x8xf32, #tpu.memory_space<vmem>>, vector<1x8x8xf32>
    %110 = vector.shape_cast %109 : vector<1x8x8xf32> to vector<8x8xf32>
    %c0_95 = arith.constant 0 : index
    %c144_96 = arith.constant 144 : index
    %111 = vector.load %arg8[%c0_95, %c144_96] : memref<8x512xf32, #tpu.memory_space<vmem>>, vector<8x256xf32>
    %cst_97 = arith.constant dense<0.000000e+00> : vector<8x256xf32>
    %112 = tpu.matmul %110, %111, %cst_97 {dimension_numbers = #tpu.dot_dimension_numbers<[1], [0], [0], [1], [0, 0, 1, 1], [], []>} : vector<8x8xf32>, vector<8x256xf32>, vector<8x256xf32> -> vector<8x256xf32>
    %113 = arith.addf %108, %112 : vector<8x256xf32>
    %c2_98 = arith.constant 2 : index
    %c0_99 = arith.constant 0 : index
    %c0_100 = arith.constant 0 : index
    %114 = vector.load %arg4[%c2_98, %c0_99, %c0_100] : memref<9x8x8xf32, #tpu.memory_space<vmem>>, vector<1x8x8xf32>
    %115 = vector.shape_cast %114 : vector<1x8x8xf32> to vector<8x8xf32>
    %c0_101 = arith.constant 0 : index
    %c113_102 = arith.constant 113 : index
    %116 = vector.load %arg8[%c0_101, %c113_102] : memref<8x512xf32, #tpu.memory_space<vmem>>, vector<8x256xf32>
    %cst_103 = arith.constant dense<0.000000e+00> : vector<8x256xf32>
    %117 = tpu.matmul %115, %116, %cst_103 {dimension_numbers = #tpu.dot_dimension_numbers<[1], [0], [0], [1], [0, 0, 1, 1], [], []>} : vector<8x8xf32>, vector<8x256xf32>, vector<8x256xf32> -> vector<8x256xf32>
    %c5_104 = arith.constant 5 : index
    %c0_105 = arith.constant 0 : index
    %c0_106 = arith.constant 0 : index
    %118 = vector.load %arg4[%c5_104, %c0_105, %c0_106] : memref<9x8x8xf32, #tpu.memory_space<vmem>>, vector<1x8x8xf32>
    %119 = vector.shape_cast %118 : vector<1x8x8xf32> to vector<8x8xf32>
    %c0_107 = arith.constant 0 : index
    %c129_108 = arith.constant 129 : index
    %120 = vector.load %arg8[%c0_107, %c129_108] : memref<8x512xf32, #tpu.memory_space<vmem>>, vector<8x256xf32>
    %cst_109 = arith.constant dense<0.000000e+00> : vector<8x256xf32>
    %121 = tpu.matmul %119, %120, %cst_109 {dimension_numbers = #tpu.dot_dimension_numbers<[1], [0], [0], [1], [0, 0, 1, 1], [], []>} : vector<8x8xf32>, vector<8x256xf32>, vector<8x256xf32> -> vector<8x256xf32>
    %122 = arith.addf %117, %121 : vector<8x256xf32>
    %c8_110 = arith.constant 8 : index
    %c0_111 = arith.constant 0 : index
    %c0_112 = arith.constant 0 : index
    %123 = vector.load %arg4[%c8_110, %c0_111, %c0_112] : memref<9x8x8xf32, #tpu.memory_space<vmem>>, vector<1x8x8xf32>
    %124 = vector.shape_cast %123 : vector<1x8x8xf32> to vector<8x8xf32>
    %c0_113 = arith.constant 0 : index
    %c145_114 = arith.constant 145 : index
    %125 = vector.load %arg8[%c0_113, %c145_114] : memref<8x512xf32, #tpu.memory_space<vmem>>, vector<8x256xf32>
    %cst_115 = arith.constant dense<0.000000e+00> : vector<8x256xf32>
    %126 = tpu.matmul %124, %125, %cst_115 {dimension_numbers = #tpu.dot_dimension_numbers<[1], [0], [0], [1], [0, 0, 1, 1], [], []>} : vector<8x8xf32>, vector<8x256xf32>, vector<8x256xf32> -> vector<8x256xf32>
    %127 = arith.addf %122, %126 : vector<8x256xf32>
    %cst_116 = arith.constant 0.000000e+00 : f32
    %128 = vector.broadcast %cst_116 : f32 to vector<8x256xf32>
    %129 = arith.select %18, %99, %128 : vector<8x256xi1>, vector<8x256xf32>
    %130 = arith.addf %113, %129 : vector<8x256xf32>
    %cst_117 = arith.constant 0.000000e+00 : f32
    %131 = vector.broadcast %cst_117 : f32 to vector<8x256xf32>
    %132 = arith.select %20, %127, %131 : vector<8x256xi1>, vector<8x256xf32>
    %133 = arith.addf %130, %132 : vector<8x256xf32>
    %c0_118 = arith.constant 0 : index
    %c0_119 = arith.constant 0 : index
    %134 = vector.load %arg5[%c0_118, %c0_119] : memref<8x1xf32, #tpu.memory_space<vmem>>, vector<8x1xf32>
    %135 = vector.broadcast %134 : vector<8x1xf32> to vector<8x256xf32>
    %136 = arith.addf %133, %135 : vector<8x256xf32>
    %cst_120 = arith.constant 0.000000e+00 : f32
    %137 = vector.broadcast %cst_120 : f32 to vector<8x256xf32>
    %138 = arith.maximumf %136, %137 : vector<8x256xf32>
    %c0_121 = arith.constant 0 : index
    %c0_122 = arith.constant 0 : index
    %c0_123 = arith.constant 0 : index
    %139 = vector.load %arg6[%c0_121, %c0_122, %c0_123] : memref<1x8x256xf32, #tpu.memory_space<vmem>>, vector<1x8x256xf32>
    %140 = vector.shape_cast %139 : vector<1x8x256xf32> to vector<8x256xf32>
    %141 = vector.shape_cast %138 : vector<8x256xf32> to vector<1x8x256xf32>
    tpu.vector_store %arg6[%c0_121, %c0_122, %c0_123], %141 {strides = array<i32>} : memref<1x8x256xf32, #tpu.memory_space<vmem>>, vector<1x8x256xf32>,
    return
  }
  func.func @transform_0(%arg0: i32) -> (i32, i32, i32) {
    %c0_i32 = arith.constant 0 : i32
    %c0_i32_0 = arith.constant 0 : i32
    %c0_i32_1 = arith.constant 0 : i32
    return %arg0, %c0_i32, %c0_i32_0 : i32, i32, i32
  }
  func.func @transform_1(%arg0: i32) -> (i32, i32, i32) {
    %c0_i32 = arith.constant 0 : i32
    %c0_i32_0 = arith.constant 0 : i32
    %c0_i32_1 = arith.constant 0 : i32
    %c0_i32_2 = arith.constant 0 : i32
    return %c0_i32, %c0_i32_0, %c0_i32_1 : i32, i32, i32
  }
  func.func @transform_2(%arg0: i32) -> (i32, i32) {
    %c0_i32 = arith.constant 0 : i32
    %c0_i32_0 = arith.constant 0 : i32
    %c0_i32_1 = arith.constant 0 : i32
    return %c0_i32, %c0_i32_0 : i32, i32
  }
  func.func @transform_3(%arg0: i32) -> (i32, i32, i32) {
    %c0_i32 = arith.constant 0 : i32
    %c0_i32_0 = arith.constant 0 : i32
    %c0_i32_1 = arith.constant 0 : i32
    %c0_i32_2 = arith.constant 0 : i32
    return %c0_i32, %c0_i32_0, %c0_i32_1 : i32, i32, i32
  }
  func.func @transform_4(%arg0: i32) -> (i32, i32) {
    %c0_i32 = arith.constant 0 : i32
    %c0_i32_0 = arith.constant 0 : i32
    %c0_i32_1 = arith.constant 0 : i32
    return %c0_i32, %c0_i32_0 : i32, i32
  }
  func.func @transform_5(%arg0: i32) -> (i32, i32, i32) {
    %c0_i32 = arith.constant 0 : i32
    %c0_i32_0 = arith.constant 0 : i32
    %c0_i32_1 = arith.constant 0 : i32
    return %arg0, %c0_i32, %c0_i32_0 : i32, i32, i32
  }
}

</mosaic_0001>

<bundles_post_ra>
// kernel: double_conv_forward.1
= control target key start
LH: loop header
LB: loop body
LE: loop exit
PB: predicated region body
PF: predicated region fallthrough
CT: control target
= control target key end

     0   :  { %s2134_s18 = smov 0   ;;  %s2391_s0 = inlined_call_operand.vmem [shape: f32[2,4,256], index: 0, kind: input, shape index: {}]   ;;  %s2392_s1 = inlined_call_operand.vmem [shape: f32[9,8,4], index: 1, kind: input, shape index: {}]   ;;  %s2393_s2 = inlined_call_operand.vmem [shape: f32[8,1], index: 2, kind: input, shape index: {}]   ;;  %s2394_s3 = inlined_call_operand.vmem [shape: f32[9,8,8], index: 3, kind: input, shape index: {}]   ;;  %s2395_s4 = inlined_call_operand.vmem [shape: f32[8,1], index: 4, kind: input, shape index: {}]   ;;  %s2396_s5 = inlined_call_operand.vmem [shape: f32[2,8,256], index: 5, kind: output, shape index: {}]  }
   0x1 LB: > { %s1976_s19 = sadd.s32 4294967295, %s2092_s18   ;;  %p1980_p0 = scmp.ge.s32.totalorder %s2092_s18, 1  ;;  %s2092_s18 = sphi %s2134_s18, %s15_s18  }
   0x2   : > { %p187_p1 = scmp.lt.s32.totalorder %s2092_s18, 3 }
   0x4   : > { %p188_p2 = pnand %p1980_p0, %p187_p1 }
   0x5   : > { %p215_p3 = scmp.lt.s32.totalorder (!%p188_p2), %s1976_s19, 1  ;;  %v2094_v0 = vmov (!%p188_p2), 0.0   ;;  %s2095_s24 = smov (!%p188_p2), 113   ;;  %vm281_vm0 = vcmask (!%p188_p2), 1043456   ;;  %vm277_vm1 = vcmask (!%p188_p2), 31744   ;;  %v1997_v7 = vld [vmem:[%s2392_s1 + $0x20] sm:$0xff] (!%p188_p2)  ;;  %v225_v63 = vlaneseq (!%p188_p2) }
   0x6   : > { %191 = sbr.rel (%p188_p2) target bundleno = 792 (0x318), region = 40  ;;  %257 = vst [vmem:[#allocation2 + $0xc] sm:$0xf] (!%p188_p2), %v2094_v0  ;;  %256 = vst [vmem:[#allocation2] sm:$0xf] (!%p188_p2), %v2094_v0  ;;  %350 = vmatprep.mubr.f32.mxu0 (!%p188_p2), %v2094_v0  ;;  %620 = vmatprep.mubr.f32.mxu1 (!%p188_p2), %v2094_v0  ;;  %s2096_s25 = smov (!%p188_p2), 1  }
   0x7   : > { %s2097_s26 = smov (!%p188_p2), 17   ;;  %s2098_s27 = smov (!%p188_p2), 127   ;;  %v2102_v12 = vmov (!%p188_p2), 0   ;;  %v1105_v14 = vld [vmem:[%s2393_s2] sm:$0xff] (!%p188_p2)  ;;  %vm274_vm2 = vcmask (!%p188_p2), 7168   ;;  %vm363_vm3 = vcmask (!%p188_p2), 138240  }
   0x8   : > { %s2099_s30 = smov (!%p188_p2), 16   ;;  %s2100_s6 = smov (!%p188_p2), 15   ;;  %2083 = vset.pattern.permute.xlu0 (!%p188_p2), %v2102_v12  ;;  %v1985_v24 = vld [vmem:[%s2392_s1 + $0x18] sm:$0xff] (!%p188_p2)  ;;  %vm457_vm4 = vcmask (!%p188_p2), 924672   ;;  %v260_v32 = vld [vmem:[%s2392_s1] sm:$0xff] (!%p188_p2)  ;;  %vm830_vm5 = vcmask (!%p188_p2), 1039360  }
   0x9   : > { %s2101_s7 = smov (!%p188_p2), 112   ;;  %s2103_s8 = smov (!%p188_p2), 111   ;;  %vm636_vm6 = vcmask (!%p188_p2), 130048   ;;  %v1992_v40 = vld [vmem:[%s2392_s1 + $0x30] sm:$0xff] (!%p188_p2)  ;;  %v1996_v44 = vld [vmem:[%s2392_s1 + $0x8] sm:$0xff] (!%p188_p2)  ;;  %vm920_vm7 = vcmask (!%p188_p2), 121856  }
   0xa   : > { %v2009_v46 = vld [vmem:[%s2392_s1 + $0x28] sm:$0xff] (!%p188_p2)  ;;  %vm730_vm8 = vcmask (!%p188_p2), 916480   ;;  %v2008_v54 = vld [vmem:[%s2392_s1 + $0x10] sm:$0xff] (!%p188_p2)  ;;  %v2004_v56 = vld [vmem:[%s2392_s1 + $0x38] sm:$0xff] (!%p188_p2)  ;;  %vm1014_vm9 = vcmask (!%p188_p2), 908288   ;;  %vm1138_vm14 = vcmask (!%p188_p2), 64512  }
   0xb   : > { %v2016_v61 = vld [vmem:[%s2392_s1 + $0x40] sm:$0xff] (!%p188_p2) }
   0xd   : > { %s2406_s19 = smov (!%p215_p3, %s1976_s19), 1  ;;  %v447_v2 = vld [vmem:[#allocation2 + $0xc] sm:$0xf] }
   0xe   : > { %s2039_s20 = sshll.u32 %s2406_s19, 3  ;;  %455 = vrot.lane.b32.xlu1 %v447_v2, %s2095_s24  ;;  %v820_v8 = vld [vmem:[#allocation2 + $0xc] sm:$0xf]  ;;  %v226_v2 = vand.u32 127, %v225_v63  ;;  %s2040_s9 = sshll.u32 %s2406_s19, 4 }
   0xf   : > { %s219_s23 = scalar_lea.vmem %s2391_s0, %s2039_s20  ;;  %v720_v11 = vld [vmem:[#allocation2 + $0xc] sm:$0xf]  ;;  %s224_s12 = scalar_lea.vmem %s2396_s5, %s2040_s9 }
  0x10   : > { %v258_v1 = vld [vmem:[%s219_s23] sm:$0xff]  ;;  %v1004_v13 = vld [vmem:[#allocation2 + $0xc] sm:$0xf] }
  0x11   : > { %259 = vst [vmem:[#allocation2 + $0x4] sm:$0xff] %v258_v1  ;;  %v450_v3 = vcombine.high %v258_v1, %v258_v1 }
  0x13   : > { %1998 = vmatprep.subr.msk.mxu1 %vm281_vm0, %v450_v3 }
  0x14   : > { %1999 = vmatpush1.msk.msra.mxu1 %vm281_vm0, %v258_v1 }
  0x15   : > { %2000 = vmatmul.mubr.msk.f32.vlgmr.msra.gmra.mrb[0].mxu1 %vm277_vm1, %v1997_v7 }
  0x16   : > { %710 = vmatprep.mubr.f32.mxu1 %v2094_v0 }
  0x18   : > { %v262_v4 = vld [vmem:[#allocation2 + $0x8] sm:$0xf]  ;;  %v261_v5 = vld [vmem:[#allocation2] sm:$0xff] }
  0x19   : > { %272 = vrot.lane.b32.xlu0 %v262_v4, %s2096_s25  ;;  %268 = vrot.lane.b32.xlu1 %v261_v5, %s2096_s25  ;;  %v267_v6 = vcombine.high %v261_v5, %v261_v5  ;;  %v543_v9 = vld [vmem:[#allocation2 + $0x8] sm:$0xf] }
  0x1a   : > { %v816_v10 = vld [vmem:[#allocation2 + $0x8] sm:$0xf] }
  0x1d   : > { %361 = vrot.lane.b32.xlu0 %v262_v4, %s2097_s26  ;;  %357 = vrot.lane.b32.xlu1 %v261_v5, %s2097_s26  ;;  %v227_v4 = vadd.s32 128, %v226_v2 }
  0x21   : > { %359 = vrot.lane.b32.xlu1 %v267_v6, %s2097_s26  ;;  %270 = vrot.lane.b32.xlu0 %v267_v6, %s2096_s25 }
  0x25   : > { %451 = vrot.lane.b32.xlu0 %v258_v1, %s2095_s24  ;;  %826 = vrot.lane.b32.xlu1 %v450_v3, %s2098_s27 }
  0x29   : > { %453 = vrot.lane.b32.xlu0 %v450_v3, %s2095_s24  ;;  %824 = vrot.lane.b32.xlu1 %v258_v1, %s2098_s27 }
  0x2d   : > { %828 = vrot.lane.b32.xlu0 %v820_v8, %s2098_s27  ;;  %634 = vrot.lane.b32.xlu1 %v543_v9, %s2099_s30 }
  0x31   : > { %632 = vrot.lane.b32.xlu0 %v267_v6, %s2099_s30  ;;  %916 = vrot.lane.b32.xlu1 %v267_v6, %s2100_s6  ;;  %v239_v6 = vand.u32 15, %v227_v4 }
  0x33   : > { %vm2264_vm11 = vcmp.ne.s32.totalorder %v239_v6, 0  ;;  %vm2276_vm13 = vcmp.ne.s32.totalorder %v239_v6, 15 }
  0x35   : > { %630 = vrot.lane.b32.xlu0 %v261_v5, %s2099_s30  ;;  %914 = vrot.lane.b32.xlu1 %v261_v5, %s2100_s6  ;;  %v232_v5 = vand.u32 15, %v226_v2  ;;  %v2031_v2 = vld [vmem:[%s2394_s3 + $0x10] sm:$0xff] }
  0x37   : > { %vm2260_vm10 = vcmp.ne.s32.totalorder %v232_v5, 0  ;;  %vm2272_vm12 = vcmp.ne.s32.totalorder %v232_v5, 15 }
  0x39   : > { %918 = vrot.lane.b32.xlu0 %v816_v10, %s2100_s6  ;;  %728 = vrot.lane.b32.xlu1 %v720_v11, %s2101_s7 }
  0x3d   : > { %726 = vrot.lane.b32.xlu0 %v450_v3, %s2101_s7  ;;  %1010 = vrot.lane.b32.xlu1 %v450_v3, %s2103_s8 }
  0x41   : > { %724 = vrot.lane.b32.xlu0 %v258_v1, %s2101_s7  ;;  %1008 = vrot.lane.b32.xlu1 %v258_v1, %s2103_s8 }
  0x45   : > { %1012 = vrot.lane.b32.xlu0 %v1004_v13, %s2103_s8 }
  0x49   : > { %1108 = vperm.xlu0 %2083, %v1105_v14  }
  0x4d   : > { %1128 = vrot.lane.b32.xlu0 %v2094_v0, %s2096_s25 }
  0x80   : > { %v456_v15 = vpop.permute.xlu1 %455 }
  0x8b   : > { %v273_v16 = vpop.permute.xlu0 %272  ;;  %v269_v17 = vpop.permute.xlu1 %268 }
  0x8f   : > { %v362_v18 = vpop.permute.xlu0 %361  ;;  %v358_v19 = vpop.permute.xlu1 %357 }
  0x93   : > { %v360_v20 = vpop.permute.xlu1 %359  ;;  %v271_v21 = vpop.permute.xlu0 %270 }
  0x94   : > { %v276_v22 = vsel %vm274_vm2, %v271_v21, %v273_v16  ;;  %v275_v23 = vsel %vm274_vm2, %v269_v17, %v271_v21  ;;  %v365_v25 = vsel %vm363_vm3, %v360_v20, %v362_v18  ;;  %v364_v26 = vsel %vm363_vm3, %v358_v19, %v360_v20 }
  0x95   : > { %1986 = vmatprep.subr.msk.mxu0 %vm281_vm0, %v276_v22 }
  0x96   : > { %1987 = vmatpush1.msk.msra.mxu0 %vm281_vm0, %v275_v23 }
  0x97   : > { %1988 = vmatmul.mubr.msk.f32.vlgmr.msra.gmra.mrb[0].mxu0 %vm277_vm1, %v1985_v24  ;;  %1989 = vmatprep.subr.msk.mxu0 %vm281_vm0, %v365_v25  ;;  %v452_v27 = vpop.permute.xlu0 %451  ;;  %v827_v28 = vpop.permute.xlu1 %826 }
  0x98   : > { %1990 = vmatpush1.msk.msra.mxu0 %vm281_vm0, %v364_v26  ;;  %437 = vmatprep.mubr.f32.mxu0 %v2094_v0 }
  0x9b   : > { %v454_v29 = vpop.permute.xlu0 %453  ;;  %v825_v30 = vpop.permute.xlu1 %824 }
  0x9c   : > { %v459_v31 = vsel %vm457_vm4, %v454_v29, %v456_v15  ;;  %v458_v33 = vsel %vm457_vm4, %v452_v27, %v454_v29  ;;  %v831_v41 = vsel %vm830_vm5, %v825_v30, %v827_v28  ;;  %v1909_v29 = vld [vmem:[%s2395_s4] sm:$0xff] }
  0x9d   : > { %1993 = vmatprep.subr.msk.mxu0 %vm281_vm0, %v459_v31 }
  0x9f   : > { %1991 = vmatmul.mubr.msk.f32.vlgmr.msra.gmra.mrb[0].mxu0 %vm277_vm1, %v260_v32  ;;  %v829_v34 = vpop.permute.xlu0 %828  ;;  %v635_v35 = vpop.permute.xlu1 %634 }
  0xa0   : > { %1994 = vmatpush1.msk.msra.mxu0 %vm281_vm0, %v458_v33  ;;  %v832_v36 = vsel %vm830_vm5, %v827_v28, %v829_v34  ;;  %531 = vmatprep.mubr.f32.mxu0 %v2094_v0  ;;  %v2026_v28 = vld [vmem:[%s2394_s3 + $0x20] sm:$0xff] }
  0xa1   : > { %2010 = vmatprep.subr.msk.mxu0 %vm281_vm0, %v832_v36 }
  0xa3   : > { %v633_v37 = vpop.permute.xlu0 %632  ;;  %v917_v38 = vpop.permute.xlu1 %916 }
  0xa4   : > { %v638_v39 = vsel %vm636_vm6, %v633_v37, %v635_v35 }
  0xa5   : > { %2001 = vmatprep.subr.msk.mxu1 %vm281_vm0, %v638_v39 }
  0xa7   : > { %1995 = vmatmul.mubr.msk.f32.vlgmr.msra.gmra.mrb[0].mxu0 %vm277_vm1, %v1992_v40  ;;  %v631_v42 = vpop.permute.xlu0 %630  ;;  %v915_v43 = vpop.permute.xlu1 %914 }
  0xa8   : > { %2011 = vmatpush1.msk.msra.mxu0 %vm281_vm0, %v831_v41  ;;  %v637_v45 = vsel %vm636_vm6, %v631_v42, %v633_v37  ;;  %904 = vmatprep.mubr.f32.mxu0 %v2094_v0  ;;  %v921_v50 = vsel %vm920_vm7, %v915_v43, %v917_v38 }
  0xa9   : > { %2002 = vmatpush1.msk.msra.mxu1 %vm281_vm0, %v637_v45 }
  0xaa   : > { %2003 = vmatmul.mubr.msk.f32.vlgmr.msra.gmra.mrb[0].mxu1 %vm277_vm1, %v1996_v44 }
  0xab   : > { %2012 = vmatmul.mubr.msk.f32.vlgmr.msra.gmra.mrb[2].mxu0 %vm277_vm1, %v2009_v46  ;;  %v919_v47 = vpop.permute.xlu0 %918  ;;  %v729_v48 = vpop.permute.xlu1 %728  ;;  %804 = vmatprep.mubr.f32.mxu1 %v2094_v0 }
  0xac   : > { %v922_v49 = vsel %vm920_vm7, %v917_v38, %v919_v47  ;;  %994 = vmatprep.mubr.f32.mxu0 %v2094_v0  ;;  %v2020_v38 = vld [vmem:[%s2394_s3 + $0x18] sm:$0xff]  ;;  %v1119_v47 = vld [vmem:[%s2394_s3] sm:$0xff] }
  0xad   : > { %2013 = vmatprep.subr.msk.mxu0 %vm281_vm0, %v922_v49 }
  0xae   : > { %2014 = vmatpush1.msk.msra.mxu0 %vm281_vm0, %v921_v50 }
  0xaf   : > { %v727_v51 = vpop.permute.xlu0 %726  ;;  %v1011_v53 = vpop.permute.xlu1 %1010 }
  0xb0   : > { %v732_v52 = vsel %vm730_vm8, %v727_v51, %v729_v48 }
  0xb1   : > { %2005 = vmatprep.subr.msk.mxu1 %vm281_vm0, %v732_v52 }
  0xb3   : > { %2015 = vmatmul.mubr.msk.f32.vlgmr.msra.gmra.mrb[2].mxu0 %vm277_vm1, %v2008_v54  ;;  %v725_v55 = vpop.permute.xlu0 %724  ;;  %v1009_v58 = vpop.permute.xlu1 %1008 }
  0xb4   : > { %v731_v57 = vsel %vm730_vm8, %v725_v55, %v727_v51  ;;  %1088 = vmatprep.mubr.f32.mxu0 %v2094_v0  ;;  %v1015_v62 = vsel %vm1014_vm9, %v1009_v58, %v1011_v53  ;;  %v2032_v58 = vld [vmem:[%s2394_s3 + $0x28] sm:$0xff] }
  0xb5   : > { %2006 = vmatpush1.msk.msra.mxu1 %vm281_vm0, %v731_v57 }
  0xb6   : > { %2007 = vmatmul.mubr.msk.f32.vlgmr.msra.gmra.mrb[0].mxu1 %vm277_vm1, %v2004_v56 }
  0xb7   : > { %v1013_v59 = vpop.permute.xlu0 %1012  ;;  %1206 = vmatprep.mubr.f32.mxu1 %v2094_v0 }
  0xb8   : > { %v1016_v60 = vsel %vm1014_vm9, %v1011_v53, %v1013_v59  ;;  %v2023_v53 = vld [vmem:[%s2394_s3 + $0x30] sm:$0xff] }
  0xb9   : > { %2017 = vmatprep.subr.msk.mxu0 %vm281_vm0, %v1016_v60 }
  0xba   : > { %2018 = vmatpush1.msk.msra.mxu0 %vm281_vm0, %v1015_v62 }
  0xbb   : > { %2019 = vmatmul.mubr.msk.f32.vlgmr.msra.gmra.mrb[2].mxu0 %vm277_vm1, %v2016_v61 }
  0xbc   : > { %1462 = vmatprep.mubr.f32.mxu0 %v2094_v0 }
  0xc8   : > { %v1109_v20 = vpop.permute.xlu0 %1108 }
  0xcc   : > { %v1129_v30 = vpop.permute.xlu0 %1128 }
 0x17a   : > { %v533_v1 = vpop.f32.mrb[0].mxu0 }
 0x17b   : > { %v535_v3 = vpop.f32.mrb[1].mxu0  ;;  %v1097_v9 = vsel %vm2260_vm10, %v533_v1, 0.0  ;;  %v2025_v1 = vld [vmem:[%s2394_s3 + $0x8] sm:$0xff] }
 0x17c   : > { %v1098_v11 = vsel %vm2264_vm11, %v535_v3, 0.0 }
 0x189   : > { %v806_v10 = vpop.f32.mrb[0].mxu1 }
 0x18a   : > { %v1099_v12 = vadd.f32 %v1097_v9, %v806_v10  ;;  %v808_v13 = vpop.f32.mrb[1].mxu1 }
 0x18b   : > { %v1100_v14 = vadd.f32 %v1098_v11, %v808_v13  ;;  %v2029_v13 = vld [vmem:[%s2394_s3 + $0x38] sm:$0xff] }
 0x18e   : > { %v1090_v17 = vpop.f32.mrb[2].mxu0 }
 0x18f   : > { %v1101_v18 = vsel %vm2272_vm12, %v1090_v17, 0.0  ;;  %v1092_v19 = vpop.f32.mrb[3].mxu0 }
 0x190   : > { %v1103_v21 = vadd.f32 %v1101_v18, %v1099_v12  ;;  %v1102_v22 = vsel %vm2276_vm13, %v1092_v19, 0.0 }
 0x191   : > { %v1104_v23 = vadd.f32 %v1102_v22, %v1100_v14 }
 0x192   : > { %v1111_v24 = vadd.f32 %v1109_v20, %v1103_v21 }
 0x193   : > { %v1112_v25 = vadd.f32 %v1109_v20, %v1104_v23 }
 0x194   : > { %v1113_v26 = vmax.f32 %v1111_v24, 0.0 }
 0x195   : > { %v1114_v27 = vmax.f32 %v1112_v25, 0.0 }
 0x196   : > { %1305 = vrot.lane.b32.xlu0 %v1113_v26, %s2095_s24  ;;  %1130 = vrot.lane.b32.xlu1 %v1113_v26, %s2096_s25 }
 0x197   : > { %1398 = vmatprep.subr.mxu0 %v1114_v27 }
 0x198   : > { %1399 = vmatpush1.msra.mxu0 %v1113_v26 }
 0x199   : > { %2027 = vmatmul.mubr.msk.f32.vlgmr.msra.gmra.mrb[4].mxu0 %vm1138_vm14, %v2026_v28 }
 0x19a   : > { %1649 = vrot.lane.b32.xlu0 %v2094_v0, %s2098_s27  ;;  %1215 = vrot.lane.b32.xlu1 %v1113_v26, %s2097_s26 }
 0x19b   : > { %1546 = vmatprep.mubr.f32.mxu0 %v2094_v0 }
 0x19e   : > { %1217 = vrot.lane.b32.xlu0 %v1114_v27, %s2097_s26  ;;  %1132 = vrot.lane.b32.xlu1 %v1114_v27, %s2096_s25 }
 0x1a2   : > { %1471 = vrot.lane.b32.xlu0 %v1113_v26, %s2099_s30  ;;  %1213 = vrot.lane.b32.xlu1 %v2094_v0, %s2097_s26 }
 0x1a6   : > { %1307 = vrot.lane.b32.xlu0 %v1114_v27, %s2095_s24  ;;  %1309 = vrot.lane.b32.xlu1 %v2094_v0, %s2095_s24 }
 0x1aa   : > { %1469 = vrot.lane.b32.xlu0 %v2094_v0, %s2099_s30  ;;  %1645 = vrot.lane.b32.xlu1 %v1113_v26, %s2098_s27 }
 0x1ae   : > { %1555 = vrot.lane.b32.xlu0 %v1113_v26, %s2101_s7  ;;  %1731 = vrot.lane.b32.xlu1 %v1113_v26, %s2100_s6 }
 0x1b2   : > { %1733 = vrot.lane.b32.xlu0 %v1114_v27, %s2100_s6  ;;  %1647 = vrot.lane.b32.xlu1 %v1114_v27, %s2098_s27 }
 0x1b6   : > { %1557 = vrot.lane.b32.xlu0 %v1114_v27, %s2101_s7  ;;  %1729 = vrot.lane.b32.xlu1 %v2094_v0, %s2100_s6 }
 0x1ba   : > { %1819 = vrot.lane.b32.xlu0 %v2094_v0, %s2103_s8  ;;  %1473 = vrot.lane.b32.xlu1 %v1114_v27, %s2099_s30 }
 0x1be   : > { %1912 = vperm.xlu0 %2083, %v1909_v29   ;;  %1559 = vrot.lane.b32.xlu1 %v2094_v0, %s2101_s7 }
 0x1c2   : > { %1817 = vrot.lane.b32.xlu1 %v1114_v27, %s2103_s8 }
 0x1c6   : > { %1815 = vrot.lane.b32.xlu1 %v1113_v26, %s2103_s8 }
 0x208   : > { %v1131_v31 = vpop.permute.xlu1 %1130  ;;  %v1306_v32 = vpop.permute.xlu0 %1305 }
 0x209   : > { %v1134_v39 = vsel %vm274_vm2, %v1129_v30, %v1131_v31 }
 0x20c   : > { %v1216_v33 = vpop.permute.xlu1 %1215  ;;  %v1650_v34 = vpop.permute.xlu0 %1649 }
 0x210   : > { %v1133_v35 = vpop.permute.xlu1 %1132  ;;  %v1218_v36 = vpop.permute.xlu0 %1217 }
 0x211   : > { %v1135_v37 = vsel %vm274_vm2, %v1131_v31, %v1133_v35  ;;  %v1220_v40 = vsel %vm363_vm3, %v1216_v33, %v1218_v36 }
 0x212   : > { %1142 = vmatprep.subr.mxu1 %v1135_v37 }
 0x213   : > { %1143 = vmatpush1.msra.mxu1 %v1134_v39 }
 0x214   : > { %v1214_v41 = vpop.permute.xlu1 %1213  ;;  %2021 = vmatmul.mubr.msk.f32.vlgmr.msra.gmra.mrb[2].mxu1 %vm1138_vm14, %v2020_v38  ;;  %1226 = vmatprep.subr.mxu1 %v1220_v40  ;;  %v1472_v42 = vpop.permute.xlu0 %1471 }
 0x215   : > { %v1219_v43 = vsel %vm363_vm3, %v1214_v41, %v1216_v33  ;;  %1290 = vmatprep.mubr.f32.mxu1 %v2094_v0 }
 0x216   : > { %1227 = vmatpush1.msra.mxu1 %v1219_v43 }
 0x218   : > { %v1310_v44 = vpop.permute.xlu1 %1309  ;;  %v1308_v45 = vpop.permute.xlu0 %1307 }
 0x219   : > { %v1312_v46 = vsel %vm457_vm4, %v1308_v45, %v1310_v44  ;;  %v1311_v48 = vsel %vm457_vm4, %v1306_v32, %v1308_v45 }
 0x21a   : > { %1318 = vmatprep.subr.mxu1 %v1312_v46 }
 0x21c   : > { %v1646_v49 = vpop.permute.xlu1 %1645  ;;  %2022 = vmatmul.mubr.msk.f32.vlgmr.msra.gmra.mrb[2].mxu1 %vm1138_vm14, %v1119_v47  ;;  %v1470_v50 = vpop.permute.xlu0 %1469 }
 0x21d   : > { %1319 = vmatpush1.msra.mxu1 %v1311_v48  ;;  %1382 = vmatprep.mubr.f32.mxu1 %v2094_v0  ;;  %v1475_v3 = vsel %vm636_vm6, %v1470_v50, %v1472_v42 }
 0x220   : > { %v1732_v51 = vpop.permute.xlu1 %1731  ;;  %v1556_v52 = vpop.permute.xlu0 %1555 }
 0x224   : > { %v1648_v54 = vpop.permute.xlu1 %1647  ;;  %2024 = vmatmul.mubr.msk.f32.vlgmr.msra.gmra.mrb[2].mxu1 %vm1138_vm14, %v2023_v53  ;;  %v1734_v55 = vpop.permute.xlu0 %1733 }
 0x225   : > { %v1651_v56 = vsel %vm830_vm5, %v1646_v49, %v1648_v54  ;;  %v1652_v57 = vsel %vm830_vm5, %v1648_v54, %v1650_v34  ;;  %1722 = vmatprep.mubr.f32.mxu1 %v2094_v0  ;;  %v1736_v59 = vsel %vm920_vm7, %v1732_v51, %v1734_v55 }
 0x226   : > { %1658 = vmatprep.subr.mxu1 %v1652_v57 }
 0x227   : > { %1659 = vmatpush1.msra.mxu1 %v1651_v56 }
 0x228   : > { %v1730_v60 = vpop.permute.xlu1 %1729  ;;  %1742 = vmatprep.subr.mxu1 %v1736_v59  ;;  %2033 = vmatmul.mubr.msk.f32.vlgmr.msra.gmra.mrb[4].mxu1 %vm1138_vm14, %v2032_v58  ;;  %v1558_v4 = vpop.permute.xlu0 %1557 }
 0x229   : > { %v1735_v61 = vsel %vm920_vm7, %v1730_v60, %v1732_v51  ;;  %1806 = vmatprep.mubr.f32.mxu1 %v2094_v0  ;;  %v1561_v9 = vsel %vm730_vm8, %v1556_v52, %v1558_v4 }
 0x22a   : > { %1743 = vmatpush1.msra.mxu1 %v1735_v61 }
 0x22c   : > { %v1474_v62 = vpop.permute.xlu1 %1473  ;;  %v1820_v10 = vpop.permute.xlu0 %1819 }
 0x22d   : > { %v1476_v63 = vsel %vm636_vm6, %v1472_v42, %v1474_v62 }
 0x22e   : > { %1482 = vmatprep.subr.mxu0 %v1476_v63 }
 0x22f   : > { %1483 = vmatpush1.msra.mxu0 %v1475_v3 }
 0x230   : > { %v1560_v5 = vpop.permute.xlu1 %1559  ;;  %2028 = vmatmul.mubr.msk.f32.vlgmr.msra.gmra.mrb[4].mxu0 %vm1138_vm14, %v2025_v1  ;;  %2034 = vmatmul.mubr.msk.f32.vlgmr.msra.gmra.mrb[4].mxu1 %vm1138_vm14, %v2031_v2 }
 0x231   : > { %v1562_v6 = vsel %vm730_vm8, %v1558_v4, %v1560_v5  ;;  %1632 = vmatprep.mubr.f32.mxu0 %v2094_v0  ;;  %1892 = vmatprep.mubr.f32.mxu1 %v2094_v0  ;;  %v2035_v0 = vld [vmem:[%s2394_s3 + $0x40] sm:$0xff] }
 0x232   : > { %1568 = vmatprep.subr.mxu0 %v1562_v6 }
 0x233   : > { %1569 = vmatpush1.msra.mxu0 %v1561_v9 }
 0x234   : > { %v1818_v11 = vpop.permute.xlu1 %1817 }
 0x235   : > { %v1822_v12 = vsel %vm1014_vm9, %v1818_v11, %v1820_v10 }
 0x236   : > { %1828 = vmatprep.subr.mxu1 %v1822_v12 }
 0x238   : > { %v1816_v14 = vpop.permute.xlu1 %1815  ;;  %2030 = vmatmul.mubr.msk.f32.vlgmr.msra.gmra.mrb[4].mxu0 %vm1138_vm14, %v2029_v13 }
 0x239   : > { %v1821_v17 = vsel %vm1014_vm9, %v1816_v14, %v1818_v11 }
 0x23a   : > { %1829 = vmatpush1.msra.mxu1 %v1821_v17 }
 0x23b   : > { %2036 = vmatmul.mubr.msk.f32.vlgmr.msra.gmra.mrb[4].mxu1 %vm1138_vm14, %v2035_v0 }
 0x23d   : > { %v1913_v31 = vpop.permute.xlu0 %1912 }
 0x2f7   : > { %v1384_v18 = vpop.f32.mrb[2].mxu1 }
 0x2f8   : > { %v1386_v19 = vpop.f32.mrb[3].mxu1  ;;  %v1901_v20 = vsel %vm2260_vm10, %v1384_v18, 0.0 }
 0x2f9   : > { %v1902_v22 = vsel %vm2264_vm11, %v1386_v19, 0.0 }
 0x30b   : > { %v1634_v21 = vpop.f32.mrb[4].mxu0 }
 0x30c   : > { %v1903_v23 = vadd.f32 %v1901_v20, %v1634_v21  ;;  %v1636_v24 = vpop.f32.mrb[5].mxu0 }
 0x30d   : > { %v1904_v25 = vadd.f32 %v1902_v22, %v1636_v24 }
 0x30e   : > { %v1894_v26 = vpop.f32.mrb[4].mxu1 }
 0x30f   : > { %v1905_v27 = vsel %vm2272_vm12, %v1894_v26, 0.0  ;;  %v1896_v28 = vpop.f32.mrb[5].mxu1 }
 0x310   : > { %v1907_v29 = vadd.f32 %v1905_v27, %v1903_v23  ;;  %v1906_v30 = vsel %vm2276_vm13, %v1896_v28, 0.0 }
 0x311   : > { %v1908_v7 = vadd.f32 %v1906_v30, %v1904_v25 }
 0x312   : > { %v1915_v32 = vadd.f32 %v1913_v31, %v1907_v29 }
 0x313   : > { %v1916_v8 = vadd.f32 %v1913_v31, %v1908_v7 }
 0x314   : > { %v1917_v33 = vmax.f32 %v1915_v32, 0.0 }
 0x315   : > { %v1918_v34 = vmax.f32 %v1916_v8, 0.0 }
 0x316   : > { %1919 = vst [vmem:[%s224_s12] sm:$0xff] %v1917_v33 }
 0x317   : > { %1920 = vst [vmem:[%s224_s12 + $0x8] sm:$0xff] %v1918_v34 }
 0x318 PF: > { %s15_s18 = sadd.s32 1, %s2092_s18  }
 0x319   : > { %p12_p4 = scmp.ge.s32.totalorder %s15_s18, 4  }
 0x31b   :  { %14 = sbr.rel (!%p12_p4) target bundleno = 1 (0x1), region = 86 }

</bundles_post_ra>
